<compile_context>
chip_gen: v7x
topology: tpu7x:2x2x1
jax: 0.10.0
libtpu: 0.0.40
codegen_flags: <defaults>
</compile_context>

<pallas_src>
import functools

import jax
import jax.numpy as jnp
from jax.experimental import pallas as pl
from jax.experimental.pallas import tpu as pltpu


def _pcubic_kernel(coef_ref, x_ref, o_ref, *, compute_dtype):
    # coef_ref: SMEM (4,) f32 -> [a, b, c, d]
    a = coef_ref[0].astype(compute_dtype)
    b = coef_ref[1].astype(compute_dtype)
    c = coef_ref[2].astype(compute_dtype)
    d = coef_ref[3].astype(compute_dtype)
    x = x_ref[...].astype(compute_dtype)
    # Horner form: ((a*x + b)*x + c)*x + d  == a*x^3 + b*x^2 + c*x + d
    y = ((a * x + b) * x + c) * x + d
    o_ref[...] = y.astype(o_ref.dtype)


def _round_up(v, m):
    return ((v + m - 1) // m) * m


def _pick_block(total, max_block, align):
    """Largest aligned block <= max_block, splitting into >=2 grid steps when
    the problem is big enough (so both v7x TensorCores get work)."""
    if total < 2 * align:
        return total  # full extent: always a legal block shape
    blk = min(max_block, _round_up(pl.cdiv(total, 2), align))
    return _round_up(blk, align)


def pcubic(x, a, b, c, d, *, tile_rows=8192, lanes=128):
    """Elementwise a*x^3 + b*x^2 + c*x + d, matching PyTorch PCubic.forward."""
    orig_shape = x.shape
    dtype = x.dtype
    n = x.size
    if n == 0:
        return x

    # bf16 stays in bf16 (bf16 VALU on v6e/v7x, halves vreg pressure); other
    # float dtypes evaluate in f32 and cast back on store.
    # TODO(synk): integer inputs would silently truncate; module is float-only.
    compute_dtype = jnp.bfloat16 if dtype == jnp.bfloat16 else jnp.float32
    kernel = functools.partial(_pcubic_kernel, compute_dtype=compute_dtype)

    # Coefficients in SMEM as f32; cast in-kernel to the compute dtype.
    coefs = jnp.stack(
        [jnp.asarray(a), jnp.asarray(b), jnp.asarray(c), jnp.asarray(d)]
    ).astype(jnp.float32)

    x_flat = jnp.ravel(x)
    dsize = x.dtype.itemsize

    if n % lanes == 0:
        # Lane-dense 2-D slab: full unmasked vst's on the output.
        rows = n // lanes
        block_rows = _pick_block(rows, tile_rows, 8)
        grid = (pl.cdiv(rows, block_rows),)
        arr = x_flat.reshape(rows, lanes)
        block_shape = (block_rows, lanes)
        out_shape = jax.ShapeDtypeStruct((rows, lanes), dtype)
        index_map = lambda i: (i, 0)
        block_bytes = block_rows * lanes * dsize
    else:
        # Ragged n: run the same kernel 1-D over the flat array and let Pallas
        # mask the ragged last block.  No host-side jnp.pad / output slice
        # (those cost two full extra HBM passes).
        block_elems = _pick_block(n, tile_rows * lanes, 8 * lanes)
        grid = (pl.cdiv(n, block_elems),)
        arr = x_flat
        block_shape = (block_elems,)
        out_shape = jax.ShapeDtypeStruct((n,), dtype)
        index_map = lambda i: (i,)
        block_bytes = block_elems * dsize

    # VMEM budget: 3 input buffers + 2 output buffers + headroom, clamped so
    # the scoped limit always fits v7x's 64 MiB physical VMEM per TensorCore.
    vmem_bytes = int(min(max(5 * block_bytes + (2 << 20), 16 << 20), 48 << 20))

    # Triple-buffer the streaming input when the grid is long enough.
    x_spec_kwargs = {}
    if hasattr(pl, "Buffered") and grid[0] >= 3:
        x_spec_kwargs["pipeline_mode"] = pl.Buffered(3)

    out = pl.pallas_call(
        kernel,
        out_shape=out_shape,
        grid_spec=pltpu.PrefetchScalarGridSpec(
            num_scalar_prefetch=0,
            grid=grid,
            in_specs=[
                pl.BlockSpec(memory_space=pltpu.SMEM),          # coefficients
                pl.BlockSpec(block_shape, index_map, **x_spec_kwargs),
            ],
            out_specs=pl.BlockSpec(block_shape, index_map),
        ),
        compiler_params=pltpu.CompilerParams(
            dimension_semantics=("parallel",),   # shards grid across TCs on v7x
            vmem_limit_bytes=vmem_bytes,
        ),
        cost_estimate=pl.CostEstimate(
            flops=6 * n, transcendentals=0, bytes_accessed=2 * n * dsize),
    )(coefs, arr)

    return out.reshape(orig_shape)


if __name__ == "__main__":
    key = jax.random.PRNGKey(0)
    # Small NCHW input consistent with an image-style module.
    x = jax.random.normal(key, (2, 4, 16, 16), dtype=jnp.float32)

    # Deterministic parameters exactly as in PCubic.__init__:
    a = jnp.float32(-1.0)
    b = jnp.float32(0.0)
    c = jnp.float32(1.0)
    d = jnp.float32(0.0)

    out = pcubic(x, a, b, c, d)
    jax.block_until_ready(out)
    ref = a * x ** 3 + b * x ** 2 + c * x + d
    assert out.shape == x.shape and out.dtype == x.dtype
    assert jnp.allclose(out, ref, atol=1e-5, rtol=1e-5)

    # Ragged-size inputs (n % 128 != 0): exercises the pad-free 1-D path,
    # both the single full-extent block and the masked ragged-last-block case.
    x_small = jax.random.normal(jax.random.PRNGKey(0), (5, 67), dtype=jnp.float32)
    out_small = pcubic(x_small, a, b, c, d)
    jax.block_until_ready(out_small)
    ref_small = a * x_small ** 3 + b * x_small ** 2 + c * x_small + d
    assert jnp.allclose(out_small, ref_small, atol=1e-5, rtol=1e-5)

    x_rag = jax.random.normal(jax.random.PRNGKey(0), (7, 429), dtype=jnp.float32)
    out_rag = pcubic(x_rag, a, b, c, d)
    jax.block_until_ready(out_rag)
    ref_rag = a * x_rag ** 3 + b * x_rag ** 2 + c * x_rag + d
    assert out_rag.shape == x_rag.shape
    assert jnp.allclose(out_rag, ref_rag, atol=1e-5, rtol=1e-5)

    print("KERNEL_OK")
</pallas_src>

<mosaic_0001>
module attributes {stable_mosaic.version = 11 : i64} {
  func.func @_pcubic_kernel(%arg0: i32, %arg1: memref<4xf32, #tpu.memory_space<smem>>, %arg2: memref<8x128xf32, #tpu.memory_space<vmem>>, %arg3: memref<8x128xf32, #tpu.memory_space<vmem>>) attributes {dimension_semantics = [#tpu.dimension_semantics<parallel>], iteration_bounds = array<i64: 2>, scalar_prefetch = 0 : i64, scratch_operands = 0 : i64, tpu.core_type = #tpu.core_type<tc>, window_params = [{transform_indices = @transform_0, window_bounds = array<i64: 4>}, {transform_indices = @transform_1, window_bounds = array<i64: 8, 128>}, {transform_indices = @transform_2, window_bounds = array<i64: 8, 128>}]} {
    %c0 = arith.constant 0 : index
    %0 = memref.load %arg1[%c0] : memref<4xf32, #tpu.memory_space<smem>>
    %c1 = arith.constant 1 : index
    %1 = memref.load %arg1[%c1] : memref<4xf32, #tpu.memory_space<smem>>
    %c2 = arith.constant 2 : index
    %2 = memref.load %arg1[%c2] : memref<4xf32, #tpu.memory_space<smem>>
    %c3 = arith.constant 3 : index
    %3 = memref.load %arg1[%c3] : memref<4xf32, #tpu.memory_space<smem>>
    %c0_0 = arith.constant 0 : index
    %c0_1 = arith.constant 0 : index
    %4 = vector.load %arg2[%c0_0, %c0_1] : memref<8x128xf32, #tpu.memory_space<vmem>>, vector<8x128xf32>
    %5 = vector.broadcast %0 : f32 to vector<8x128xf32>
    %6 = arith.mulf %5, %4 : vector<8x128xf32>
    %7 = vector.broadcast %1 : f32 to vector<8x128xf32>
    %8 = arith.addf %6, %7 : vector<8x128xf32>
    %9 = arith.mulf %8, %4 : vector<8x128xf32>
    %10 = vector.broadcast %2 : f32 to vector<8x128xf32>
    %11 = arith.addf %9, %10 : vector<8x128xf32>
    %12 = arith.mulf %11, %4 : vector<8x128xf32>
    %13 = vector.broadcast %3 : f32 to vector<8x128xf32>
    %14 = arith.addf %12, %13 : vector<8x128xf32>
    %c0_2 = arith.constant 0 : index
    %c0_3 = arith.constant 0 : index
    %15 = vector.load %arg3[%c0_2, %c0_3] : memref<8x128xf32, #tpu.memory_space<vmem>>, vector<8x128xf32>
    tpu.vector_store %arg3[%c0_2, %c0_3], %14 {strides = array<i32>} : memref<8x128xf32, #tpu.memory_space<vmem>>, vector<8x128xf32>,
    return
  }
  func.func @transform_0(%arg0: i32) -> i32 {
    %c0_i32 = arith.constant 0 : i32
    %c0_i32_0 = arith.constant 0 : i32
    return %c0_i32 : i32
  }
  func.func @transform_1(%arg0: i32) -> (i32, i32) {
    %c0_i32 = arith.constant 0 : i32
    %c0_i32_0 = arith.constant 0 : i32
    return %arg0, %c0_i32 : i32, i32
  }
  func.func @transform_2(%arg0: i32) -> (i32, i32) {
    %c0_i32 = arith.constant 0 : i32
    %c0_i32_0 = arith.constant 0 : i32
    return %arg0, %c0_i32 : i32, i32
  }
}

</mosaic_0001>

<bundles_post_ra>
// kernel: tpu_custom_call.1
= control target key start
LH: loop header
LB: loop body
LE: loop exit
PB: predicated region body
PF: predicated region fallthrough
CT: control target
= control target key end

     0   :  { %7 = vsyncpa [#allocation5], 0  ;;  %s695_s0 = inlined_call_operand.hbm [shape: f32[4], index: 0, kind: input, shape index: {}]   ;;  %s696_s1 = inlined_call_operand.hbm [shape: f32[16,128], index: 1, kind: input, shape index: {}]   ;;  %s697_s2 = inlined_call_operand.hbm [shape: f32[16,128], index: 2, kind: output, shape index: {}]  }
   0x1   :  { %8 = vsyncpa [#allocation3], 0 }
   0x2   :  { %10 = vsyncpa [#allocation3 + $0x1], 0 }
   0x3   :  { %11 = vsyncpa [#allocation4], 0 }
   0x4   :  { %13 = vsyncpa [#allocation4 + $0x1], 0  ;;  %s490_s9 = smov 0   ;;  %s492_s10 = smov 0  }
   0x5   :  { %s494_s11 = smov 0   ;;  %s496_s12 = smov 0  }
   0x6 LB: > { %s511_s13 = sadd.s32 4294967295, %s470_s12   ;;  %s283_s14 = sadd.s32 4294967294, %s470_s12   ;;  %s470_s12 = sphi %s496_s12, %s718_s12   ;;  %s466_s11 = sphi %s494_s11, %s717_s11   ;;  %s462_s10 = sphi %s492_s10, %s716_s10   ;;  %s458_s9 = sphi %s490_s9, %s715_s9  }
   0x7   : > { %p60_p0 = scmp.ne.s32.totalorder %s462_s10, %s458_s9  ;;  %p698_p1 = scmp.eq.s32.totalorder %s511_s13, 0 }
   0x8   : > { %p90_p3 = scmp.eq.s32.totalorder %s283_s14, 1  ;;  %p284_p5 = scmp.ge.s32.totalorder %s470_s12, 1 }
   0x9   : > { %p520_p4 = por %p698_p1, %p60_p0  ;;  %p97_p7 = scmp.lt.s32.totalorder %s470_s12, 3 }
   0xa   : > { %p525_p6 = por %p90_p3, %p60_p0  ;;  %s536_s18 = sadd.s32 1, %s470_s12  }
   0xb   : > { %s701_s15 = scalar_select %p520_p4, 1, 0 }
   0xc   : > { %s702_s16 = scalar_select %p525_p6, 1, 0 }
   0xd   : > { %p530_p8 = pnand %p284_p5, %p97_p7  ;;  %s44_s19 = ssub.s32 %s470_s12, %s536_s18 }
   0xe   : > { %s47_s20 = sadd.s32 1, %s466_s11  ;;  %p549_p12 = scmp.eq.s32.totalorder %s44_s19, 0 }
   0xf   : > { %p308_p10 = pneg %p530_p8  ;;  %p54_p13 = scmp.ne.s32.totalorder %s466_s11, %s462_s10 }
  0x10   : > { %p55_p0 = scmp.eq.s32.totalorder %s470_s12, 0  ;;  %p321_p3 = scmp.lt.s32.totalorder %s470_s12, 2 }
  0x11   : > { %p545_p11 = pnand %p308_p10, %p698_p1  ;;  %s357_s25 = scalar_lea.hbm %s695_s0, 16 }
  0x12   : > { %p358_p5 = scmp.ne.s32.totalorder %s695_s0, %s357_s25  ;;  %p364_p1 = scmp.lt.u32.totalorder %s357_s25, %s695_s0 }
  0x13   : > { %p359_p7 = pneg %p545_p11 }
  0x15   : > { %p360_p10 = pnand %p359_p7, %p358_p5 }
  0x17   : > { %p361_p9 = pneg %p360_p10 }
  0x19   : > { %p366_p2 = pnand %p364_p1, %p361_p9 }
  0x1b   : > { %369 = shalt.err (!%p366_p2)
}
  0x1c   : > { %s472_s30 = smov [#allocation2]   ;;  %p56_p1 = por %p55_p0, %p54_p13 }
  0x1d   : > { %311 = dma.hbm_to_smem (!%p545_p11), %s695_s0, 16, %s472_s30, [#allocation5]  }
  0x1e   : > { %s576_s5 = scalar_select %p549_p12, %s466_s11, %s47_s20  }
  0x1f   : > { %p706_p2 = scmp.eq.s32.totalorder %s511_s13, 1  ;;  %s119_s7 = sand.u32 1, %s466_s11  }
  0x20   : > { %s288_s8 = sshll.u32 %s470_s12, 7  ;;  %s287_s14 = sshll.u32 %s119_s7, 3 }
  0x21   : > { %p588_p9 = por %p706_p2, %p54_p13  ;;  %s597_s23 = scalar_lea.hbm %s696_s1, %s288_s8 }
  0x22   : > { %s123_s20 = scalar_lea.vmem [#allocation6], %s287_s14  ;;  %p601_p11 = pnand %p321_p3, %p56_p1 }
  0x23   : > { %s707_s6 = scalar_select %p588_p9, 1, 0 }
  0x24   : > { %s130_s22 = sshll.u32 %s123_s20, 4  ;;  %s120_s25 = scalar_lea.sflag [#allocation3], %s119_s7  ;;  %s605_s22 = int_to_ptr.vmem [resolvable:$true] %s130_s22 }
  0x25   : > { %s370_s26 = scalar_lea.hbm %s597_s23, 128  ;;  %p372_p13 = pneg %p601_p11 }
  0x26   : > { %p371_p12 = scmp.ne.s32.totalorder %s597_s23, %s370_s26  ;;  %s375_s29 = scalar_lea.hbm %s696_s1, 256 }
  0x27   : > { %p376_p3 = scmp.lt.u32.totalorder %s597_s23, %s696_s1  ;;  %p377_p7 = scmp.lt.u32.totalorder %s375_s29, %s370_s26 }
  0x28   : > { %p373_p0 = pnand %p372_p13, %p371_p12  ;;  %p379_p1 = scmp.lt.u32.totalorder %s370_s26, %s597_s23 }
  0x29   : > { %p378_p10 = por %p377_p7, %p376_p3 }
  0x2a   : > { %p374_p5 = pneg %p373_p0 }
  0x2b   : > { %p380_p2 = por %p379_p1, %p378_p10 }
  0x2d   : > { %p381_p6 = pnand %p380_p2, %p374_p5 }
  0x2f   : > { %384 = shalt.err (!%p381_p6)
}
  0x30   : > { %s385_s4 = scalar_lea.vmem %s605_s22, 128  ;;  %s473_s7 = smov [#allocation6]  }
  0x31   : > { %p386_p12 = scmp.ne.s32.totalorder %s605_s22, %s385_s4  ;;  %s390_s8 = sshll.u32 %s473_s7, 4  ;;  %s391_s8 = int_to_ptr.vmem [resolvable:$false] %s390_s8 }
  0x32   : > { %s392_s14 = scalar_lea.vmem %s391_s8, 256  ;;  %p393_p4 = scmp.lt.s32.totalorder %s605_s22, %s391_s8 }
  0x33   : > { %p388_p0 = pnand %p386_p12, %p372_p13  ;;  %p394_p3 = scmp.lt.s32.totalorder %s392_s14, %s385_s4 }
  0x35   : > { %p389_p9 = pneg %p388_p0  ;;  %p395_p7 = por %p394_p3, %p393_p4 }
  0x37   : > { %p396_p10 = pnand %p395_p7, %p389_p9 }
  0x39   : > { %399 = shalt.err (!%p396_p10)
}
  0x3a   : > { %315 = dma.hbm_to_vmem [thread:$0]  (!%p601_p11), %s597_s23, 128, %s605_s22, %s120_s25  }
  0x3b   : > { %139 = sbr.rel (%p530_p8) target bundleno = 106 (0x6a), region = 28  ;;  %p709_p6 = scmp.eq.s32.totalorder (!%p530_p8), %s511_s13, 0 }
  0x42   : > { %445 = dma.done.wait (%p709_p6), [#allocation5], 16   ;;  %p710_p13 = pmov %p709_p6 }
  0x43   : > { %s639_s19 = sand.u32 1, %s462_s10   ;;  %p711_p4 = scmp.ne.s32.totalorder %s701_s15, 0 }
  0x44   : > { %447 = vsyncadd (%p710_p13), [#allocation5], 4294967280  ;;  %s291_s21 = sshll.u32 %s639_s19, 3  ;;  %s146_s20 = scalar_lea.sflag [#allocation3], %s639_s19 }
  0x45   : > { %s149_s24 = scalar_lea.vmem [#allocation6], %s291_s21 }
  0x46   : > { %449 = dma.done.wait (%p711_p4), %s146_s20, 128  }
  0x47   : > { %451 = vsyncadd (%p711_p4), %s146_s20, 4294967168 }
  0x48   : > { %154 = sfence }
  0x49   : > { %s171_s17 = sld [smem:[#allocation2]]  ;;  %s293_s23 = sld [smem:[#allocation2 + $0x1]]  ;;  %v175_v0 = vld [vmem:[%s149_s24] sm:$0xff] }
  0x4a   : > { %s294_s22 = sld [smem:[#allocation2 + $0x2]]  ;;  %s295_s25 = sld [smem:[#allocation2 + $0x3]] }
  0x4b   : > { %s170_s26 = scalar_lea.vmem [#allocation7], %s291_s21  ;;  %s297_s15 = sshll.u32 %s511_s13, 7 }
  0x4c   : > { %s201_s27 = sshll.u32 %s170_s26, 4  ;;  %s653_s30 = scalar_lea.hbm %s697_s2, %s297_s15  ;;  %s648_s27 = int_to_ptr.vmem [resolvable:$true] %s201_s27 }
  0x4d   : > { %s188_s3 = scalar_lea.sflag [#allocation4], %s639_s19  ;;  %s400_s4 = scalar_lea.vmem %s648_s27, 128 }
  0x4e   : > { %p401_p8 = scmp.ne.s32.totalorder %s648_s27, %s400_s4  ;;  %p712_p9 = scmp.ne.s32.totalorder %s707_s6, 0 }
  0x4f   : > { %v176_v1 = vstv %s171_s17  ;;  %v178_v3 = vstv %s293_s23  ;;  %s474_s13 = smov [#allocation7]  }
  0x50   : > { %v177_v2 = vmul.f32 %v176_v1, %v175_v0  ;;  %v181_v5 = vstv %s294_s22  ;;  %v184_v8 = vstv %s295_s25  ;;  %p402_p11 = pnand %p401_p8, %p712_p9  ;;  %s404_s7 = sshll.u32 %s474_s13, 4  ;;  %s405_s7 = int_to_ptr.vmem [resolvable:$false] %s404_s7 }
  0x51   : > { %s406_s8 = scalar_lea.vmem %s405_s7, 256  ;;  %p407_p1 = scmp.lt.s32.totalorder %s648_s27, %s405_s7 }
  0x52   : > { %v179_v4 = vadd.f32 %v178_v3, %v177_v2  ;;  %p403_p5 = pneg %p402_p11  ;;  %p408_p2 = scmp.lt.s32.totalorder %s406_s8, %s400_s4 }
  0x54   : > { %v180_v6 = vmul.f32 %v179_v4, %v175_v0  ;;  %p409_p12 = por %p408_p2, %p407_p1 }
  0x56   : > { %v182_v7 = vadd.f32 %v181_v5, %v180_v6  ;;  %p410_p0 = pnand %p409_p12, %p403_p5 }
  0x58   : > { %v183_v9 = vmul.f32 %v182_v7, %v175_v0 }
  0x5a   : > { %v185_v10 = vadd.f32 %v184_v8, %v183_v9 }
  0x5c   : > { %186 = vst [vmem:[%s170_s26] sm:$0xff] %v185_v10 }
  0x5d   : > { %413 = shalt.err (!%p410_p0)
}
  0x5e   : > { %s414_s14 = scalar_lea.hbm %s653_s30, 128  ;;  %s418_s20 = scalar_lea.hbm %s697_s2, 256 }
  0x5f   : > { %p415_p3 = scmp.ne.s32.totalorder %s653_s30, %s414_s14  ;;  %p419_p6 = scmp.lt.u32.totalorder %s653_s30, %s697_s2 }
  0x60   : > { %p420_p13 = scmp.lt.u32.totalorder %s418_s20, %s414_s14  ;;  %p422_p8 = scmp.lt.u32.totalorder %s414_s14, %s653_s30 }
  0x61   : > { %p416_p7 = pnand %p415_p3, %p712_p9 }
  0x62   : > { %p421_p4 = por %p420_p13, %p419_p6 }
  0x63   : > { %p417_p10 = pneg %p416_p7 }
  0x64   : > { %p423_p11 = por %p422_p8, %p421_p4 }
  0x66   : > { %p424_p5 = pnand %p423_p11, %p417_p10 }
  0x68   : > { %427 = shalt.err (!%p424_p5)
}
  0x69   : > { %306 = dma.vmem_to_hbm [thread:$0]  (%p712_p9), %s648_s27, 128, %s653_s30, %s188_s3  }
  0x6a PF: > { %s213_s23 = sand.u32 1, %s458_s9   ;;  %p713_p1 = scmp.ne.s32.totalorder %s702_s16, 0 }
  0x6b   : > { %p714_p2 = scmp.ge.s32.totalorder %s470_s12, 2  ;;  %s214_s22 = scalar_lea.sflag [#allocation4], %s213_s23 }
  0x6d   : > { %p317_p12 = pnand %p714_p2, %p713_p1 }
  0x6f   : > { %453 = dma.done.wait (!%p317_p12), %s214_s22, 128  }
  0x70   : > { %455 = vsyncadd (!%p317_p12), %s214_s22, 4294967168  ;;  %p16_p0 = scmp.ge.s32.totalorder %s536_s18, 4   ;;  %s715_s9 = smov %s462_s10 }
  0x71   : > { %s716_s10 = smov %s466_s11  ;;  %s717_s11 = smov %s576_s5 }
  0x72   : > { %s718_s12 = smov %s536_s18  ;;  %18 = sbr.rel (!%p16_p0) target bundleno = 6 (0x6), region = 78 }
  0x79   :  { %219 = vsyncpa [#allocation3], 1 }
  0x7a   :  { %221 = vsyncpa [#allocation3 + $0x1], 1 }
  0x7b   :  { %222 = vsyncpa [#allocation4], 1 }
  0x7c   :  { %224 = vsyncpa [#allocation4 + $0x1], 1 }
  0x7d   :  { %225 = vsyncpa [#allocation5], 1 }
  0x7e   :  { %227 = vsyncpa [#allocation5 + $0x1], 1 }

</bundles_post_ra>
